<compile_context>
chip_gen: v7x
topology: tpu7x:2x2x1
jax: 0.10.0
libtpu: 0.0.40
codegen_flags: <defaults>
</compile_context>

<pallas_src>
import functools
import math

import jax
import jax.numpy as jnp
from jax.experimental import pallas as pl
from jax.experimental.pallas import tpu as pltpu


# ----------------------------------------------------------------------------
# helpers
# ----------------------------------------------------------------------------
def _pick_tile(dim, target, step):
    """Largest multiple of `step` <= `target` that divides `dim`; else the full dim."""
    if dim <= target:
        return dim
    t = (target // step) * step
    while t >= step:
        if dim % t == 0:
            return t
        t -= step
    return dim


def _gelu(x):
    # TODO(synk): HF BERT (BETO) uses exact erf GELU; tanh approximation used in-kernel.
    c = 0.7978845608028654  # sqrt(2/pi)
    return 0.5 * x * (1.0 + jnp.tanh(c * (x + 0.044715 * x * x * x)))


_VMEM_LIMIT = 48 * 1024 * 1024  # fits v7x (64 MiB physical); generous for v5e/v6e (128 MiB)


# ----------------------------------------------------------------------------
# Pallas kernels
# ----------------------------------------------------------------------------
def dense_kernel(x_ref, w_ref, b_ref, o_ref, *, activation):
    """y = act(x @ W + b).  Grid = (M/tm, N/tn); full-K blocks (no reduction axis)."""
    y = jnp.dot(x_ref[...], w_ref[...], preferred_element_type=jnp.float32) + b_ref[...]
    if activation == "gelu":
        y = _gelu(y)
    elif activation == "tanh":
        y = jnp.tanh(y)
    o_ref[...] = y.astype(o_ref.dtype)


def dense_add_ln_kernel(x_ref, w_ref, b_ref, r_ref, g_ref, bln_ref, o_ref, *, eps):
    """y = LayerNorm(x @ W + b + residual).  Grid = (M/tm,); full K and full hidden N."""
    h = jnp.dot(x_ref[...], w_ref[...], preferred_element_type=jnp.float32)
    h = h + b_ref[...] + r_ref[...].astype(jnp.float32)
    mean = jnp.mean(h, axis=-1, keepdims=True)
    var = jnp.mean((h - mean) ** 2, axis=-1, keepdims=True)
    y = (h - mean) * jax.lax.rsqrt(var + eps)
    o_ref[...] = (y * g_ref[...] + bln_ref[...]).astype(o_ref.dtype)


def layernorm_kernel(x_ref, g_ref, b_ref, o_ref, *, eps):
    """Plain LayerNorm over the last axis (embedding LN; no residual)."""
    h = x_ref[...].astype(jnp.float32)
    mean = jnp.mean(h, axis=-1, keepdims=True)
    var = jnp.mean((h - mean) ** 2, axis=-1, keepdims=True)
    y = (h - mean) * jax.lax.rsqrt(var + eps)
    o_ref[...] = (y * g_ref[...] + b_ref[...]).astype(o_ref.dtype)


def attn_kernel(q_ref, kt_ref, v_ref, bias_ref, o_ref, *, scale):
    """Single-pass softmax attention over the full (pre-transposed) K/V sequence.

    Grid = (B*nH, S/tq).  Blocks: q (1, tq, d), kt (1, d, S), v (1, S, d), bias (1, 1, S)."""
    q = q_ref[0]                                   # (tq, d)  bf16
    kt = kt_ref[0]                                 # (d, S)   bf16 (lane-dense)
    v = v_ref[0]                                   # (S, d)   bf16

    s = jnp.dot(q, kt, preferred_element_type=jnp.float32) * scale   # (tq, S) fp32
    s = s + bias_ref[0]                                              # additive -1e4 mask bias

    m = jnp.max(s, axis=-1, keepdims=True)
    p = jnp.exp(s - m)
    l = jnp.sum(p, axis=-1, keepdims=True)

    ctx = jnp.dot(p.astype(v.dtype), v, preferred_element_type=jnp.float32)  # (tq, d)
    o_ref[0] = (ctx * pl.reciprocal(l, approx=True)).astype(o_ref.dtype)


def pooler_cls_kernel(x_ref, wp_ref, bp_ref, wc_ref, bc_ref, o_ref):
    """logits = tanh(cls @ Wp + bp) @ Wc + bc  (fused pooler + classifier head)."""
    pooled = jnp.tanh(
        jnp.dot(x_ref[...], wp_ref[...], preferred_element_type=jnp.float32) + bp_ref[...])
    logits = jnp.dot(pooled.astype(wc_ref.dtype), wc_ref[...],
                     preferred_element_type=jnp.float32) + bc_ref[...]
    o_ref[...] = logits


# ----------------------------------------------------------------------------
# Pallas wrappers
# ----------------------------------------------------------------------------
def pallas_dense(x2d, w, b, activation=None, out_dtype=None):
    M, K = x2d.shape
    N = w.shape[1]
    if out_dtype is None:
        out_dtype = x2d.dtype
    tm = _pick_tile(M, 512, 16)
    tn = _pick_tile(N, 512, 128)
    grid = (M // tm, N // tn)
    return pl.pallas_call(
        functools.partial(dense_kernel, activation=activation),
        out_shape=jax.ShapeDtypeStruct((M, N), out_dtype),
        grid=grid,
        in_specs=[
            pl.BlockSpec((tm, K), lambda i, j: (i, 0)),
            pl.BlockSpec((K, tn), lambda i, j: (0, j)),
            pl.BlockSpec((1, tn), lambda i, j: (0, j)),
        ],
        out_specs=pl.BlockSpec((tm, tn), lambda i, j: (i, j)),
        compiler_params=pltpu.CompilerParams(
            dimension_semantics=("parallel", "parallel"),
            vmem_limit_bytes=_VMEM_LIMIT),
    )(x2d, w, b)


def pallas_dense_add_ln(x2d, w, b, resid2d, gamma, beta, eps=1e-12):
    M, K = x2d.shape
    N = w.shape[1]
    tm = _pick_tile(M, 512, 16)
    grid = (M // tm,)
    return pl.pallas_call(
        functools.partial(dense_add_ln_kernel, eps=eps),
        out_shape=jax.ShapeDtypeStruct((M, N), resid2d.dtype),
        grid=grid,
        in_specs=[
            pl.BlockSpec((tm, K), lambda i: (i, 0)),
            pl.BlockSpec((K, N), lambda i: (0, 0)),
            pl.BlockSpec((1, N), lambda i: (0, 0)),
            pl.BlockSpec((tm, N), lambda i: (i, 0)),
            pl.BlockSpec((1, N), lambda i: (0, 0)),
            pl.BlockSpec((1, N), lambda i: (0, 0)),
        ],
        out_specs=pl.BlockSpec((tm, N), lambda i: (i, 0)),
        compiler_params=pltpu.CompilerParams(
            dimension_semantics=("parallel",),
            vmem_limit_bytes=_VMEM_LIMIT),
    )(x2d, w, b, resid2d, gamma, beta)


def pallas_layernorm(x2d, gamma, beta, out_dtype, eps=1e-12):
    M, H = x2d.shape
    tm = _pick_tile(M, 512, 16)
    return pl.pallas_call(
        functools.partial(layernorm_kernel, eps=eps),
        out_shape=jax.ShapeDtypeStruct((M, H), out_dtype),
        grid=(M // tm,),
        in_specs=[
            pl.BlockSpec((tm, H), lambda i: (i, 0)),
            pl.BlockSpec((1, H), lambda i: (0, 0)),
            pl.BlockSpec((1, H), lambda i: (0, 0)),
        ],
        out_specs=pl.BlockSpec((tm, H), lambda i: (i, 0)),
        compiler_params=pltpu.CompilerParams(dimension_semantics=("parallel",)),
    )(x2d, gamma, beta)


def pallas_attention(q, kt, v, bias_b, *, scale, n_heads):
    """q/v: [B*nH, S, d] bf16; kt: [B*nH, d, S] bf16; bias_b: [B, 1, S] fp32 additive bias."""
    BH, S, d = q.shape
    tq = _pick_tile(S, 256, 16)
    grid = (BH, S // tq)
    return pl.pallas_call(
        functools.partial(attn_kernel, scale=scale),
        out_shape=jax.ShapeDtypeStruct((BH, S, d), q.dtype),
        grid=grid,
        in_specs=[
            pl.BlockSpec((1, tq, d), lambda bh, qi: (bh, qi, 0)),
            pl.BlockSpec((1, d, S), lambda bh, qi: (bh, 0, 0)),
            pl.BlockSpec((1, S, d), lambda bh, qi: (bh, 0, 0)),
            pl.BlockSpec((1, 1, S), lambda bh, qi: (bh // n_heads, 0, 0)),
        ],
        out_specs=pl.BlockSpec((1, tq, d), lambda bh, qi: (bh, qi, 0)),
        compiler_params=pltpu.CompilerParams(
            dimension_semantics=("parallel", "parallel")),
    )(q, kt, v, bias_b)


def pallas_pooler_classifier(cls_tok, wp, bp, wc, bc):
    B, H = cls_tok.shape
    NP = wc.shape[1]
    return pl.pallas_call(
        pooler_cls_kernel,
        out_shape=jax.ShapeDtypeStruct((B, NP), jnp.float32),
        grid=(1,),
        in_specs=[
            pl.BlockSpec((B, H), lambda i: (0, 0)),
            pl.BlockSpec((H, H), lambda i: (0, 0)),
            pl.BlockSpec((1, H), lambda i: (0, 0)),
            pl.BlockSpec((H, NP), lambda i: (0, 0)),
            pl.BlockSpec((1, NP), lambda i: (0, 0)),
        ],
        out_specs=pl.BlockSpec((B, NP), lambda i: (0, 0)),
    )(cls_tok, wp, bp, wc, bc)


# ----------------------------------------------------------------------------
# Parameter init (deterministic, synthetic — no checkpoint load).
# Weights pre-fused (Q|K|V) and pre-cast to bf16; biases / LN params pre-shaped (1, N) fp32.
# ----------------------------------------------------------------------------
def init_params(key, vocab, max_pos, type_vocab, hidden, n_layers, inter, n_classes):
    keys = iter(jax.random.split(key, 8 + 8 * n_layers))

    def nrm(shape):
        return jax.random.normal(next(keys), shape, jnp.float32) * 0.02

    wdt = jnp.bfloat16
    n_pad = max(128, n_classes)
    cls_w = nrm((hidden, n_classes))

    params = {
        "word_emb": nrm((vocab, hidden)),
        "pos_emb": nrm((max_pos, hidden)),
        "type_emb": nrm((type_vocab, hidden)),
        "emb_ln_g": jnp.ones((1, hidden), jnp.float32),
        "emb_ln_b": jnp.zeros((1, hidden), jnp.float32),
        "layers": [],
        "pooler_w": nrm((hidden, hidden)).astype(wdt),
        "pooler_b": jnp.zeros((1, hidden), jnp.float32),
        "cls_w_pad": jnp.zeros((hidden, n_pad), jnp.float32)
                        .at[:, :n_classes].set(cls_w).astype(wdt),
        "cls_b_pad": jnp.zeros((1, n_pad), jnp.float32),
        "n_classes": n_classes,
    }
    for _ in range(n_layers):
        wq, wk, wv = nrm((hidden, hidden)), nrm((hidden, hidden)), nrm((hidden, hidden))
        params["layers"].append({
            "wqkv": jnp.concatenate([wq, wk, wv], axis=1).astype(wdt),
            "bqkv": jnp.zeros((1, 3 * hidden), jnp.float32),
            "wo": nrm((hidden, hidden)).astype(wdt),
            "bo": jnp.zeros((1, hidden), jnp.float32),
            "attn_ln_g": jnp.ones((1, hidden), jnp.float32),
            "attn_ln_b": jnp.zeros((1, hidden), jnp.float32),
            "wi": nrm((hidden, inter)).astype(wdt),
            "bi": jnp.zeros((1, inter), jnp.float32),
            "wf": nrm((inter, hidden)).astype(wdt),
            "bf": jnp.zeros((1, hidden), jnp.float32),
            "ffn_ln_g": jnp.ones((1, hidden), jnp.float32),
            "ffn_ln_b": jnp.zeros((1, hidden), jnp.float32),
        })
    return params


# ----------------------------------------------------------------------------
# Forward pass (mirrors BETOMusicForKidsClassifier.forward, inference semantics)
# ----------------------------------------------------------------------------
def beto_classifier_forward(params, input_ids, attention_mask, *, n_heads):
    B, S = input_ids.shape
    H = params["word_emb"].shape[1]
    d = H // n_heads
    BH = B * n_heads
    act_dtype = jnp.bfloat16

    # --- BERT embeddings (gather = glue, stays in plain JAX) ---
    pos = jnp.arange(S)
    emb = (params["word_emb"][input_ids]
           + params["pos_emb"][pos][None, :, :]
           + params["type_emb"][0][None, None, :])          # token_type_ids == 0
    x2d = pallas_layernorm(emb.reshape(B * S, H),
                           params["emb_ln_g"], params["emb_ln_b"],
                           out_dtype=act_dtype)

    # Additive attention bias precomputed once per forward: 0 keep, -1e4 masked (HF-style).
    bias_b = ((attention_mask.astype(jnp.float32) - 1.0) * 10000.0).reshape(B, 1, S)

    scale = 1.0 / math.sqrt(d)

    # TODO(synk): head split/merge stays as fused XLA slice+transposes; head_dim (< 128 lanes)
    # cannot be a legal BlockSpec lane block.
    for lp in params["layers"]:
        # Fused Q|K|V projection: one (H, 3H) matmul, weights pre-fused at init.
        qkv = pallas_dense(x2d, lp["wqkv"], lp["bqkv"])              # [B*S, 3H] bf16
        qkv5 = qkv.reshape(B, S, 3, n_heads, d)
        q = qkv5[:, :, 0].transpose(0, 2, 1, 3).reshape(BH, S, d)    # [B*nH, S, d]
        kt = qkv5[:, :, 1].transpose(0, 2, 3, 1).reshape(BH, d, S)   # [B*nH, d, S] (pre-transposed)
        v = qkv5[:, :, 2].transpose(0, 2, 1, 3).reshape(BH, S, d)    # [B*nH, S, d]

        ctx = pallas_attention(q, kt, v, bias_b, scale=scale, n_heads=n_heads)  # [B*nH, S, d]
        ctx2d = ctx.reshape(B, n_heads, S, d).transpose(0, 2, 1, 3).reshape(B * S, H)

        # attention output projection fused with residual-add + LayerNorm
        x2d = pallas_dense_add_ln(ctx2d, lp["wo"], lp["bo"], x2d,
                                  lp["attn_ln_g"], lp["attn_ln_b"])

        # FFN: up-projection + GELU, then down-projection fused with residual + LayerNorm
        inter = pallas_dense(x2d, lp["wi"], lp["bi"], activation="gelu")
        x2d = pallas_dense_add_ln(inter, lp["wf"], lp["bf"], x2d,
                                  lp["ffn_ln_g"], lp["ffn_ln_b"])

    # --- pooler + dropout(identity at inference) + classifier head (fused, lane-padded) ---
    cls_tok = x2d.reshape(B, S, H)[:, 0, :]                          # [B, H] bf16
    logits_pad = pallas_pooler_classifier(cls_tok, params["pooler_w"], params["pooler_b"],
                                          params["cls_w_pad"], params["cls_b_pad"])
    return logits_pad[:, :params["n_classes"]]


# ----------------------------------------------------------------------------
if __name__ == "__main__":
    VOCAB, MAX_POS, TYPE_VOCAB = 50, 16, 2
    HIDDEN, N_LAYERS, N_HEADS, INTER = 32, 2, 2, 64
    N_CLASSES = 2          # len(category_mapping)
    B, S = 2, 8

    key = jax.random.PRNGKey(0)
    k_params, k_ids = jax.random.split(key)

    params = init_params(k_params, VOCAB, MAX_POS, TYPE_VOCAB,
                         HIDDEN, N_LAYERS, INTER, N_CLASSES)

    input_ids = jax.random.randint(k_ids, (B, S), 0, VOCAB, dtype=jnp.int32)
    attention_mask = jnp.ones((B, S), jnp.int32).at[1, 6:].set(0)  # pad tail of 2nd example

    logits = beto_classifier_forward(params, input_ids, attention_mask, n_heads=N_HEADS)
    jax.block_until_ready(logits)

    assert logits.shape == (B, N_CLASSES)
    assert logits.dtype == jnp.float32
    assert bool(jnp.all(jnp.isfinite(logits)))
    print("KERNEL_OK")
</pallas_src>

<mosaic_0001>
module attributes {stable_mosaic.version = 11 : i64} {
  func.func @layernorm_kernel(%arg0: i32, %arg1: memref<16x32xf32, #tpu.memory_space<vmem>>, %arg2: memref<1x32xf32, #tpu.memory_space<vmem>>, %arg3: memref<1x32xf32, #tpu.memory_space<vmem>>, %arg4: memref<16x32xbf16, #tpu.memory_space<vmem>>) attributes {dimension_semantics = [#tpu.dimension_semantics<parallel>], iteration_bounds = array<i64: 1>, scalar_prefetch = 0 : i64, scratch_operands = 0 : i64, tpu.core_type = #tpu.core_type<tc>, window_params = [{transform_indices = @transform_0, window_bounds = array<i64: 16, 32>}, {pipeline_mode = #tpu.pipeline_mode<synchronous>, transform_indices = @transform_1, window_bounds = array<i64: 1, 32>}, {pipeline_mode = #tpu.pipeline_mode<synchronous>, transform_indices = @transform_2, window_bounds = array<i64: 1, 32>}, {transform_indices = @transform_3, window_bounds = array<i64: 16, 32>}]} {
    %c0 = arith.constant 0 : index
    %c0_0 = arith.constant 0 : index
    %0 = vector.load %arg1[%c0, %c0_0] : memref<16x32xf32, #tpu.memory_space<vmem>>, vector<16x32xf32>
    %cst = arith.constant dense<0.000000e+00> : vector<16xf32>
    %1 = vector.multi_reduction <add>, %0, %cst [1] : vector<16x32xf32> to vector<16xf32>
    %2 = vector.shape_cast %1 : vector<16xf32> to vector<16x1xf32>
    %cst_1 = arith.constant 3.200000e+01 : f32
    %3 = vector.broadcast %cst_1 : f32 to vector<16x1xf32>
    %4 = arith.divf %2, %3 : vector<16x1xf32>
    %5 = vector.broadcast %4 : vector<16x1xf32> to vector<16x32xf32>
    %6 = arith.subf %0, %5 : vector<16x32xf32>
    %7 = arith.mulf %6, %6 : vector<16x32xf32>
    %cst_2 = arith.constant dense<0.000000e+00> : vector<16xf32>
    %8 = vector.multi_reduction <add>, %7, %cst_2 [1] : vector<16x32xf32> to vector<16xf32>
    %9 = vector.shape_cast %8 : vector<16xf32> to vector<16x1xf32>
    %cst_3 = arith.constant 3.200000e+01 : f32
    %10 = vector.broadcast %cst_3 : f32 to vector<16x1xf32>
    %11 = arith.divf %9, %10 : vector<16x1xf32>
    %12 = vector.broadcast %4 : vector<16x1xf32> to vector<16x32xf32>
    %13 = arith.subf %0, %12 : vector<16x32xf32>
    %cst_4 = arith.constant 9.99999996E-13 : f32
    %14 = vector.broadcast %cst_4 : f32 to vector<16x1xf32>
    %15 = arith.addf %11, %14 : vector<16x1xf32>
    %16 = math.rsqrt %15 : vector<16x1xf32>
    %17 = vector.broadcast %16 : vector<16x1xf32> to vector<16x32xf32>
    %18 = arith.mulf %13, %17 : vector<16x32xf32>
    %c0_5 = arith.constant 0 : index
    %c0_6 = arith.constant 0 : index
    %19 = vector.load %arg2[%c0_5, %c0_6] : memref<1x32xf32, #tpu.memory_space<vmem>>, vector<1x32xf32>
    %20 = vector.broadcast %19 : vector<1x32xf32> to vector<16x32xf32>
    %21 = arith.mulf %18, %20 : vector<16x32xf32>
    %c0_7 = arith.constant 0 : index
    %c0_8 = arith.constant 0 : index
    %22 = vector.load %arg3[%c0_7, %c0_8] : memref<1x32xf32, #tpu.memory_space<vmem>>, vector<1x32xf32>
    %23 = vector.broadcast %22 : vector<1x32xf32> to vector<16x32xf32>
    %24 = arith.addf %21, %23 : vector<16x32xf32>
    %25 = arith.truncf %24 : vector<16x32xf32> to vector<16x32xbf16>
    %c0_9 = arith.constant 0 : index
    %c0_10 = arith.constant 0 : index
    %26 = vector.load %arg4[%c0_9, %c0_10] : memref<16x32xbf16, #tpu.memory_space<vmem>>, vector<16x32xbf16>
    tpu.vector_store %arg4[%c0_9, %c0_10], %25 {strides = array<i32>} : memref<16x32xbf16, #tpu.memory_space<vmem>>, vector<16x32xbf16>,
    return
  }
  func.func @transform_0(%arg0: i32) -> (i32, i32) {
    %c0_i32 = arith.constant 0 : i32
    %c0_i32_0 = arith.constant 0 : i32
    return %arg0, %c0_i32 : i32, i32
  }
  func.func @transform_1(%arg0: i32) -> (i32, i32) {
    %c0_i32 = arith.constant 0 : i32
    %c0_i32_0 = arith.constant 0 : i32
    %c0_i32_1 = arith.constant 0 : i32
    return %c0_i32, %c0_i32_0 : i32, i32
  }
  func.func @transform_2(%arg0: i32) -> (i32, i32) {
    %c0_i32 = arith.constant 0 : i32
    %c0_i32_0 = arith.constant 0 : i32
    %c0_i32_1 = arith.constant 0 : i32
    return %c0_i32, %c0_i32_0 : i32, i32
  }
  func.func @transform_3(%arg0: i32) -> (i32, i32) {
    %c0_i32 = arith.constant 0 : i32
    %c0_i32_0 = arith.constant 0 : i32
    return %arg0, %c0_i32 : i32, i32
  }
}

</mosaic_0001>

<bundles_post_ra>
// kernel: tpu_custom_call.1
= control target key start
LH: loop header
LB: loop body
LE: loop exit
PB: predicated region body
PF: predicated region fallthrough
CT: control target
= control target key end

     0   :  { %8 = vsyncpa [#allocation3], 0  ;;  %s229_s0 = inlined_call_operand.hbm [shape: f32[16,32], index: 0, kind: input, shape index: {}]   ;;  %s230_s1 = inlined_call_operand.vmem [shape: f32[1,32], index: 1, kind: input, shape index: {}]   ;;  %s231_s2 = inlined_call_operand.vmem [shape: f32[1,32], index: 2, kind: input, shape index: {}]   ;;  %s232_s3 = inlined_call_operand.hbm [shape: bf16[16,32], index: 3, kind: output, shape index: {}]  }
   0x1   :  { %9 = vsyncpa [#allocation4], 0  ;;  %s169_s12 = smov [#allocation2]   ;;  %s121_s16 = scalar_lea.hbm %s229_s0, 256 }
   0x2   :  { %s15_s13 = sshll.u32 %s169_s12, 4  ;;  %p122_p0 = scmp.ne.s32.totalorder %s229_s0, %s121_s16  ;;  %s16_s13 = int_to_ptr.vmem [resolvable:$true] %s15_s13 }
   0x3   :  { %p125_p1 = scmp.lt.u32.totalorder %s121_s16, %s229_s0 }
   0x5   :  { %p127_p2 = pnand %p125_p1, %p122_p0 }
   0x7   :  { %130 = shalt.err (!%p127_p2)
}
   0x8   :  { %s131_s21 = scalar_lea.vmem %s16_s13, 256  ;;  %p136_p4 = scmp.lt.s32.totalorder %s16_s13, %s16_s13 }
   0x9   :  { %p132_p3 = scmp.ne.s32.totalorder %s16_s13, %s131_s21  ;;  %p137_p5 = scmp.lt.s32.totalorder %s131_s21, %s131_s21 }
   0xb   :  { %p138_p6 = por %p137_p5, %p136_p4 }
   0xd   :  { %p139_p7 = pnand %p138_p6, %p132_p3 }
   0xf   :  { %142 = shalt.err (!%p139_p7)
}
  0x10   :  { %s170_s22 = smov 128   ;;  %s171_s23 = smov 8  }
  0x11   :  { %21 = dma.hbm_to_vmem [thread:$0]  %s229_s0, 256, %s16_s13, [#allocation3], %s170_s22, %s170_s22, %s171_s23  }
  0x12   :  { %165 = dma.done.wait [#allocation3], 256  }
  0x13   :  { %166 = vsyncadd [#allocation3], 4294967040  ;;  %vm31_vm0 = vcmask 261120   ;;  %v29_v0 = vld [vmem:[#allocation2] sm:$0xff]  ;;  %v30_v1 = vld [vmem:[#allocation2 + $0x8] sm:$0xff]  ;;  %vm85_vm1 = vcmask 257024  }
  0x14   :  { %v32_v2 = vsel %vm31_vm0, %v29_v0, 0.0  ;;  %v35_v3 = vsel %vm31_vm0, %v30_v1, 0.0  ;;  %v105_v21 = vld [vmem:[%s230_s1] ss:$0 sm:$0xff]  ;;  %s172_s29 = smov [#allocation5]  }
  0x15   :  { %33 = vadd.xlane.f32.xlu0 %v32_v2  ;;  %v106_v23 = vld [vmem:[%s231_s2] ss:$0 sm:$0xff]  ;;  %s93_s30 = sshll.u32 %s172_s29, 4  ;;  %s94_s30 = int_to_ptr.vmem [resolvable:$true] %s93_s30 }
  0x16   :  { %s143_s1 = scalar_lea.vmem %s94_s30, 128  ;;  %p148_p9 = scmp.lt.s32.totalorder %s94_s30, %s94_s30 }
  0x17   :  { %p144_p8 = scmp.ne.s32.totalorder %s94_s30, %s143_s1  ;;  %p149_p10 = scmp.lt.s32.totalorder %s143_s1, %s143_s1 }
  0x19   :  { %36 = vadd.xlane.f32.xlu0 %v35_v3  ;;  %p150_p11 = por %p149_p10, %p148_p9 }
  0x1b   :  { %p151_p12 = pnand %p150_p11, %p144_p8 }
  0xa2   :  { %v34_v4 = vpop.xlane.xlu0 %33 }
  0xa3   :  { %v39_v5 = vmul.f32 0.03125, %v34_v4 }
  0xa5   :  { %v41_v6 = vsub.f32 %v29_v0, %v39_v5 }
  0xa6   :  { %v37_v7 = vpop.xlane.xlu0 %36 }
  0xa7   :  { %v40_v8 = vmul.f32 0.03125, %v37_v7  ;;  %v43_v9 = vmul.f32 %v41_v6, %v41_v6 }
  0xa9   :  { %v42_v10 = vsub.f32 %v30_v1, %v40_v8  ;;  %v45_v11 = vsel %vm31_vm0, %v43_v9, 0.0 }
  0xaa   :  { %46 = vadd.xlane.f32.xlu1 %v45_v11 }
  0xab   :  { %v44_v12 = vmul.f32 %v42_v10, %v42_v10 }
  0xad   :  { %v48_v13 = vsel %vm31_vm0, %v44_v12, 0.0 }
  0xae   :  { %49 = vadd.xlane.f32.xlu1 %v48_v13 }
 0x137   :  { %v47_v14 = vpop.xlane.xlu1 %46 }
 0x138   :  { %v51_v15 = vmul.f32 0.03125, %v47_v14 }
 0x13a   :  { %v53_v16 = vadd.f32 1e-12, %v51_v15 }
 0x13b   :  { %v50_v17 = vpop.xlane.xlu1 %49 }
 0x13c   :  { %117 = vrsqrt.f32 %v53_v16  ;;  %v52_v18 = vmul.f32 0.03125, %v50_v17 }
 0x13e   :  { %v54_v19 = vadd.f32 1e-12, %v52_v18 }
 0x140   :  { %119 = vrsqrt.f32 %v54_v19 }
 0x146   :  { %v118_v20 = vpop.eup %117 }
 0x147   :  { %v57_v22 = vmul.f32 %v118_v20, %v41_v6 }
 0x149   :  { %v66_v24 = vmul.f32 %v105_v21, %v57_v22 }
 0x14a   :  { %v120_v25 = vpop.eup %119 }
 0x14b   :  { %v58_v26 = vmul.f32 %v120_v25, %v42_v10  ;;  %v75_v27 = vadd.f32 %v106_v23, %v66_v24 }
 0x14d   :  { %v67_v28 = vmul.f32 %v105_v21, %v58_v26  ;;  %v109_v29 = vpack.c.bf16 %v75_v27, %v75_v27 }
 0x14f   :  { %v76_v30 = vadd.f32 %v106_v23, %v67_v28  ;;  %86 = vst.msk [vmem:[#allocation5] sm:$0xf] %vm85_vm1, %v109_v29 }
 0x151   :  { %v110_v31 = vpack.c.bf16 %v76_v30, %v76_v30 }
 0x153   :  { %87 = vst.msk [vmem:[#allocation5 + $0x4] sm:$0xf] %vm85_vm1, %v110_v31 }
 0x154   :  { %154 = shalt.err (!%p151_p12)
}
 0x155   :  { %s155_s5 = scalar_lea.hbm %s232_s3, 128 }
 0x156   :  { %p156_p13 = scmp.ne.s32.totalorder %s232_s3, %s155_s5  ;;  %p159_p0 = scmp.lt.u32.totalorder %s155_s5, %s232_s3 }
 0x158   :  { %p161_p1 = pnand %p159_p0, %p156_p13 }
 0x15a   :  { %164 = shalt.err (!%p161_p1)
}
 0x15b   :  { %s173_s10 = smov 64   ;;  %s174_s11 = smov 4  }
 0x15c   :  { %99 = dma.vmem_to_hbm [thread:$0]  %s94_s30, 128, %s232_s3, [#allocation4], %s173_s10, %s173_s10, %s174_s11  }
 0x15d   :  { %167 = dma.done.wait [#allocation4], 128  }
 0x15e   :  { %168 = vsyncadd [#allocation4], 4294967168 }
 0x15f   :  { %103 = vsyncpa [#allocation3], 1 }
 0x160   :  { %104 = vsyncpa [#allocation4], 1 }

</bundles_post_ra>
